<compile_context>
chip_gen: v5e
topology: v5e:2x2
jax: 0.10.0
libtpu: 0.0.40
codegen_flags: <defaults>
</compile_context>

<pallas_src>
import functools

import jax
import jax.numpy as jnp
from jax import lax
from jax.experimental import pallas as pl
from jax.experimental.pallas import tpu as pltpu


def conv_bnstats_kernel(x_ref, w_ref, out_ref, sum_ref, ssq_ref, *,
                        KH, stride, OH, B):
    """Fused ReLU + implicit-im2col conv (one matmul) + BN partial statistics.

    x_ref   : (B, Hp, Wp*C_in)        bf16  padded input rows, B images
    w_ref   : (KH*Wp*C_in, lanes_p)   bf16  banded weight (lane-padded)
    out_ref : (B, OH, lanes_p)        bf16  lane-dense conv output
    sum_ref : (1, 1, lanes_p)         f32   per-group column sums
    ssq_ref : (1, 1, lanes_p)         f32   per-group column sums of squares
    """
    # ReLU on the padded image (padding zeros are ReLU-invariant).
    x = jnp.maximum(x_ref[...], 0)

    # Implicit im2col along H: take the KH strided row slices and concatenate
    # them along the K axis, so the whole conv is a single
    # (B*OH, KH*Wp*C_in) x (KH*Wp*C_in, lanes) MXU push (f32 accumulation).
    hi = stride * (OH - 1) + 1
    slices = [x[:, kh:kh + hi:stride, :] for kh in range(KH)]   # KH x (B,OH,WC)
    patches = jnp.concatenate(slices, axis=-1)                  # (B, OH, KH*WC)
    patches = patches.reshape(B * OH, patches.shape[-1])        # (M, KH*WC)

    acc = jnp.dot(patches, w_ref[...],
                  preferred_element_type=jnp.float32)           # (M, lanes_p)

    # Lane-dense unmasked store of the conv result (bf16 intermediate).
    out_ref[...] = acc.reshape(out_ref.shape).astype(out_ref.dtype)
    # BN partial statistics fused into the epilogue, from the f32 accumulator.
    sum_ref[...] = jnp.sum(acc, axis=0, keepdims=True).reshape(sum_ref.shape)
    ssq_ref[...] = jnp.sum(acc * acc, axis=0, keepdims=True).reshape(ssq_ref.shape)


def bn_apply_kernel(x_ref, scale_ref, shift_ref, o_ref):
    # y = x * (gamma / sqrt(var+eps)) + (beta - mean * gamma / sqrt(var+eps)),
    # bf16 in / f32 math / bf16 out, scale/shift pre-broadcast to lane layout.
    xv = x_ref[...].astype(jnp.float32)
    o_ref[...] = (xv * scale_ref[...] + shift_ref[...]).astype(o_ref.dtype)


def _banded_weight(weight_oihw, Wp, OW, stride, lanes_p, compute_dtype):
    """Build the banded matrix W[kh*Wp*C_in + wi*C_in + ci, ow*C_out + c]."""
    C_out, C_in, KH, KW = weight_oihw.shape
    w_hwio = jnp.transpose(weight_oihw.astype(jnp.float32), (2, 3, 1, 0))
    wi = jnp.arange(Wp)[:, None]                       # (Wp, 1)
    ow = jnp.arange(OW)[None, :]                       # (1, OW)
    kw_idx = wi - ow * stride                          # (Wp, OW)
    valid = (kw_idx >= 0) & (kw_idx < KW)
    kw_safe = jnp.clip(kw_idx, 0, KW - 1)
    gathered = w_hwio[:, kw_safe, :, :]                # (KH, Wp, OW, C_in, C_out)
    band = jnp.where(valid[None, :, :, None, None], gathered, 0.0)
    band = jnp.transpose(band, (0, 1, 3, 2, 4))        # (KH, Wp, C_in, OW, C_out)
    band = band.reshape(KH * Wp * C_in, OW * C_out)    # collapsed-K layout
    lanes = OW * C_out
    if lanes_p > lanes:                                # zero-pad to 128 lanes
        band = jnp.pad(band, ((0, 0), (0, lanes_p - lanes)))
    return band.astype(compute_dtype)


def _round_up(a, b):
    return (a + b - 1) // b * b


def _largest_divisor_leq(n, k):
    k = max(1, min(n, k))
    for d in range(k, 0, -1):
        if n % d == 0:
            return d
    return 1


def conv_op(x_nchw, weight_oihw, gamma, beta, *, stride, padding,
            eps=1e-5, compute_dtype=jnp.bfloat16):
    N, C_in, H, W = x_nchw.shape
    C_out, _, KH, KW = weight_oihw.shape
    OH = (H + 2 * padding - KH) // stride + 1
    OW = (W + 2 * padding - KW) // stride + 1
    Hp, Wp = H + 2 * padding, W + 2 * padding
    WC = Wp * C_in
    KWC = KH * WC
    lanes = OW * C_out
    lanes_p = _round_up(lanes, 128)                    # lane-dense, unmasked vst

    # Batch B images per grid step (M = B*OH ~ 128-256 rows), keeping at least
    # 2 grid steps when N >= 2 so both v7x TensorCores get work.
    if N >= 2:
        b_want = max(1, -(-256 // OH))                 # ceil(256 / OH)
        B = _largest_divisor_leq(N, min(N // 2, b_want))
    else:
        B = 1
    G = N // B

    # --- wrapper glue: NCHW -> NHWC, zero-pad, fold (W, C_in), cast bf16 ---
    x = jnp.transpose(x_nchw, (0, 2, 3, 1))
    xp = jnp.pad(x, ((0, 0), (padding, padding), (padding, padding), (0, 0)))
    x_rows = xp.reshape(N, Hp, WC).astype(compute_dtype)

    w_band = _banded_weight(weight_oihw, Wp, OW, stride, lanes_p, compute_dtype)

    # --- explicit VMEM budget (weight single-buffered, others double) ---
    isz = jnp.dtype(compute_dtype).itemsize
    vmem_need = (2 * B * Hp * WC * isz            # x blocks (double-buffered)
                 + 1 * KWC * lanes_p * isz        # banded weight (Buffered(1))
                 + 2 * B * OH * lanes_p * isz     # conv-out blocks
                 + 4 * lanes_p * 4                # sum / ssq blocks
                 + B * OH * KWC * isz             # in-kernel patch matrix
                 + 2 * B * OH * lanes_p * 4)      # f32 accumulator + temporaries
    vmem_limit = int(min(48 * 2**20, max(32 * 2**20, 2 * vmem_need)))

    # --- kernel 1: ReLU + conv (single collapsed-K matmul) + BN partials ---
    kernel1 = functools.partial(conv_bnstats_kernel,
                                KH=KH, stride=stride, OH=OH, B=B)
    conv_out, sums, ssqs = pl.pallas_call(
        kernel1,
        out_shape=(
            jax.ShapeDtypeStruct((N, OH, lanes_p), compute_dtype),
            jax.ShapeDtypeStruct((G, 1, lanes_p), jnp.float32),
            jax.ShapeDtypeStruct((G, 1, lanes_p), jnp.float32),
        ),
        grid_spec=pltpu.PrefetchScalarGridSpec(
            num_scalar_prefetch=0,
            grid=(G,),
            in_specs=[
                pl.BlockSpec((B, Hp, WC), lambda g: (g, 0, 0)),
                # constant weight: single-buffer it (index map never changes)
                pl.BlockSpec((KWC, lanes_p), lambda g: (0, 0),
                             pipeline_mode=pl.Buffered(buffer_count=1)),
            ],
            out_specs=(
                pl.BlockSpec((B, OH, lanes_p), lambda g: (g, 0, 0)),
                pl.BlockSpec((1, 1, lanes_p), lambda g: (g, 0, 0)),
                pl.BlockSpec((1, 1, lanes_p), lambda g: (g, 0, 0)),
            ),
        ),
        compiler_params=pltpu.CompilerParams(
            dimension_semantics=("parallel",),
            vmem_limit_bytes=vmem_limit),
    )(x_rows, w_band)

    # --- tiny stats finalize in plain JAX (C_out-sized vectors) ---
    cnt = N * OH * OW
    ch_sum = jnp.sum(sums[:, 0, :lanes].reshape(G, OW, C_out), axis=(0, 1))
    ch_ssq = jnp.sum(ssqs[:, 0, :lanes].reshape(G, OW, C_out), axis=(0, 1))
    mean = ch_sum / cnt
    var = jnp.maximum(ch_ssq / cnt - mean * mean, 0.0)   # biased var, clamped
    scale = gamma.astype(jnp.float32) * lax.rsqrt(var + eps)
    shift = beta.astype(jnp.float32) - mean * scale
    scale_l = jnp.pad(jnp.tile(scale, OW), (0, lanes_p - lanes)).reshape(1, lanes_p)
    shift_l = jnp.pad(jnp.tile(shift, OW), (0, lanes_p - lanes)).reshape(1, lanes_p)

    # --- kernel 2: tiled, lane-dense, in-place BN normalize ---
    rows = N * OH
    x2d = conv_out.reshape(rows, lanes_p)
    if rows <= 1024:
        tr = min(rows, _round_up(-(-rows // 2), 8))      # >= 2 grid steps
    else:
        tr = 1024
    y2d = pl.pallas_call(
        bn_apply_kernel,
        out_shape=jax.ShapeDtypeStruct((rows, lanes_p), compute_dtype),
        grid_spec=pltpu.PrefetchScalarGridSpec(
            num_scalar_prefetch=0,
            grid=(pl.cdiv(rows, tr),),
            in_specs=[
                pl.BlockSpec((tr, lanes_p), lambda i: (i, 0)),
                pl.BlockSpec((1, lanes_p), lambda i: (0, 0)),
                pl.BlockSpec((1, lanes_p), lambda i: (0, 0)),
            ],
            out_specs=pl.BlockSpec((tr, lanes_p), lambda i: (i, 0)),
        ),
        compiler_params=pltpu.CompilerParams(
            dimension_semantics=("parallel",),
            vmem_limit_bytes=vmem_limit),
        input_output_aliases={0: 0},                     # normalize in place
    )(x2d, scale_l, shift_l)

    # strip lane padding, back to NCHW in f32
    y = y2d[:, :lanes].astype(jnp.float32).reshape(N, OH, OW, C_out)
    return jnp.transpose(y, (0, 3, 1, 2))


if __name__ == "__main__":
    # small shapes consistent with the module: NCHW input
    N, C_in, H, W = 2, 4, 16, 16
    C_out, ksize, stride, padding = 8, 3, 1, 1

    key = jax.random.PRNGKey(0)
    kx, kw = jax.random.split(key)
    x = jax.random.normal(kx, (N, C_in, H, W), dtype=jnp.float32)
    weight = jax.random.normal(kw, (C_out, C_in, ksize, ksize),
                               dtype=jnp.float32) * 0.1
    gamma = jnp.ones((C_out,), jnp.float32)   # BatchNorm affine weight init
    beta = jnp.zeros((C_out,), jnp.float32)   # BatchNorm affine bias init

    fwd = jax.jit(lambda x_, w_, g_, b_: conv_op(
        x_, w_, g_, b_, stride=stride, padding=padding))
    out = jax.block_until_ready(fwd(x, weight, gamma, beta))

    # pure-JAX f32 reference (ReLU -> conv -> training-mode BN)
    ref_conv = lax.conv_general_dilated(
        jnp.maximum(x, 0.0), weight,
        window_strides=(stride, stride),
        padding=[(padding, padding), (padding, padding)],
        dimension_numbers=("NCHW", "OIHW", "NCHW"))
    mean = ref_conv.mean(axis=(0, 2, 3), keepdims=True)
    var = ref_conv.var(axis=(0, 2, 3), keepdims=True)
    ref = ((ref_conv - mean) / jnp.sqrt(var + 1e-5)
           * gamma.reshape(1, -1, 1, 1) + beta.reshape(1, -1, 1, 1))
    assert out.shape == ref.shape
    # bf16 MXU inputs / bf16 intermediate with f32 accumulation & statistics
    assert jnp.allclose(out, ref, atol=3e-2, rtol=3e-2), \
        float(jnp.max(jnp.abs(out - ref)))

    print("KERNEL_OK")
</pallas_src>

<mosaic_0001>
module attributes {stable_mosaic.version = 11 : i64} {
  func.func @conv_bnstats_kernel(%arg0: i32, %arg1: memref<1x18x72xbf16, #tpu.memory_space<vmem>>, %arg2: memref<216x128xbf16, #tpu.memory_space<vmem>>, %arg3: memref<1x16x128xbf16, #tpu.memory_space<vmem>>, %arg4: memref<1x1x128xf32, #tpu.memory_space<vmem>>, %arg5: memref<1x1x128xf32, #tpu.memory_space<vmem>>) attributes {dimension_semantics = [#tpu.dimension_semantics<parallel>], iteration_bounds = array<i64: 2>, scalar_prefetch = 0 : i64, scratch_operands = 0 : i64, tpu.core_type = #tpu.core_type<tc>, window_params = [{transform_indices = @transform_0, window_bounds = array<i64: 1, 18, 72>}, {pipeline_mode = #tpu.pipeline_mode<synchronous>, transform_indices = @transform_1, window_bounds = array<i64: 216, 128>}, {transform_indices = @transform_2, window_bounds = array<i64: 1, 16, 128>}, {transform_indices = @transform_3, window_bounds = array<i64: 1, 1, 128>}, {transform_indices = @transform_4, window_bounds = array<i64: 1, 1, 128>}]} {
    %c0 = arith.constant 0 : index
    %c0_0 = arith.constant 0 : index
    %c0_1 = arith.constant 0 : index
    %0 = vector.load %arg1[%c0, %c0_0, %c0_1] : memref<1x18x72xbf16, #tpu.memory_space<vmem>>, vector<1x18x72xbf16>
    %cst = arith.constant 0.000000e+00 : bf16
    %1 = vector.broadcast %cst : bf16 to vector<1x18x72xbf16>
    %2 = arith.maximumf %0, %1 : vector<1x18x72xbf16>
    %3 = vector.extract_strided_slice %2 {offsets = [0, 0, 0], sizes = [1, 16, 72], strides = [1, 1, 1]} : vector<1x18x72xbf16> to vector<1x16x72xbf16>
    %4 = vector.extract_strided_slice %2 {offsets = [0, 1, 0], sizes = [1, 16, 72], strides = [1, 1, 1]} : vector<1x18x72xbf16> to vector<1x16x72xbf16>
    %5 = vector.extract_strided_slice %2 {offsets = [0, 2, 0], sizes = [1, 16, 72], strides = [1, 1, 1]} : vector<1x18x72xbf16> to vector<1x16x72xbf16>
    %6 = tpu.concatenate %3, %4, %5 in 2 : vector<1x16x72xbf16>, vector<1x16x72xbf16>, vector<1x16x72xbf16> -> vector<1x16x216xbf16>
    %7 = vector.shape_cast %6 : vector<1x16x216xbf16> to vector<16x216xbf16>
    %c0_2 = arith.constant 0 : index
    %c0_3 = arith.constant 0 : index
    %8 = vector.load %arg2[%c0_2, %c0_3] : memref<216x128xbf16, #tpu.memory_space<vmem>>, vector<216x128xbf16>
    %cst_4 = arith.constant dense<0.000000e+00> : vector<16x128xf32>
    %9 = tpu.matmul %7, %8, %cst_4 {dimension_numbers = #tpu.dot_dimension_numbers<[1], [0], [0], [1], [0, 0, 1, 1], [], []>} : vector<16x216xbf16>, vector<216x128xbf16>, vector<16x128xf32> -> vector<16x128xf32>
    %10 = vector.shape_cast %9 : vector<16x128xf32> to vector<1x16x128xf32>
    %11 = arith.truncf %10 : vector<1x16x128xf32> to vector<1x16x128xbf16>
    %c0_5 = arith.constant 0 : index
    %c0_6 = arith.constant 0 : index
    %c0_7 = arith.constant 0 : index
    %12 = vector.load %arg3[%c0_5, %c0_6, %c0_7] : memref<1x16x128xbf16, #tpu.memory_space<vmem>>, vector<1x16x128xbf16>
    tpu.vector_store %arg3[%c0_5, %c0_6, %c0_7], %11 {strides = array<i32>} : memref<1x16x128xbf16, #tpu.memory_space<vmem>>, vector<1x16x128xbf16>,
    %cst_8 = arith.constant dense<0.000000e+00> : vector<128xf32>
    %13 = vector.multi_reduction <add>, %9, %cst_8 [0] : vector<16x128xf32> to vector<128xf32>
    %14 = vector.shape_cast %13 : vector<128xf32> to vector<1x128xf32>
    %15 = vector.shape_cast %14 : vector<1x128xf32> to vector<1x1x128xf32>
    %c0_9 = arith.constant 0 : index
    %c0_10 = arith.constant 0 : index
    %c0_11 = arith.constant 0 : index
    %16 = vector.load %arg4[%c0_9, %c0_10, %c0_11] : memref<1x1x128xf32, #tpu.memory_space<vmem>>, vector<1x1x128xf32>
    tpu.vector_store %arg4[%c0_9, %c0_10, %c0_11], %15 {strides = array<i32>} : memref<1x1x128xf32, #tpu.memory_space<vmem>>, vector<1x1x128xf32>,
    %17 = arith.mulf %9, %9 : vector<16x128xf32>
    %cst_12 = arith.constant dense<0.000000e+00> : vector<128xf32>
    %18 = vector.multi_reduction <add>, %17, %cst_12 [0] : vector<16x128xf32> to vector<128xf32>
    %19 = vector.shape_cast %18 : vector<128xf32> to vector<1x128xf32>
    %20 = vector.shape_cast %19 : vector<1x128xf32> to vector<1x1x128xf32>
    %c0_13 = arith.constant 0 : index
    %c0_14 = arith.constant 0 : index
    %c0_15 = arith.constant 0 : index
    %21 = vector.load %arg5[%c0_13, %c0_14, %c0_15] : memref<1x1x128xf32, #tpu.memory_space<vmem>>, vector<1x1x128xf32>
    tpu.vector_store %arg5[%c0_13, %c0_14, %c0_15], %20 {strides = array<i32>} : memref<1x1x128xf32, #tpu.memory_space<vmem>>, vector<1x1x128xf32>,
    return
  }
  func.func @transform_0(%arg0: i32) -> (i32, i32, i32) {
    %c0_i32 = arith.constant 0 : i32
    %c0_i32_0 = arith.constant 0 : i32
    %c0_i32_1 = arith.constant 0 : i32
    return %arg0, %c0_i32, %c0_i32_0 : i32, i32, i32
  }
  func.func @transform_1(%arg0: i32) -> (i32, i32) {
    %c0_i32 = arith.constant 0 : i32
    %c0_i32_0 = arith.constant 0 : i32
    %c0_i32_1 = arith.constant 0 : i32
    return %c0_i32, %c0_i32_0 : i32, i32
  }
  func.func @transform_2(%arg0: i32) -> (i32, i32, i32) {
    %c0_i32 = arith.constant 0 : i32
    %c0_i32_0 = arith.constant 0 : i32
    %c0_i32_1 = arith.constant 0 : i32
    return %arg0, %c0_i32, %c0_i32_0 : i32, i32, i32
  }
  func.func @transform_3(%arg0: i32) -> (i32, i32, i32) {
    %c0_i32 = arith.constant 0 : i32
    %c0_i32_0 = arith.constant 0 : i32
    %c0_i32_1 = arith.constant 0 : i32
    return %arg0, %c0_i32, %c0_i32_0 : i32, i32, i32
  }
  func.func @transform_4(%arg0: i32) -> (i32, i32, i32) {
    %c0_i32 = arith.constant 0 : i32
    %c0_i32_0 = arith.constant 0 : i32
    %c0_i32_1 = arith.constant 0 : i32
    return %arg0, %c0_i32, %c0_i32_0 : i32, i32, i32
  }
}

module attributes {stable_mosaic.version = 11 : i64} {
  func.func @bn_apply_kernel(%arg0: i32, %arg1: memref<16x128xbf16, #tpu.memory_space<vmem>>, %arg2: memref<1x128xf32, #tpu.memory_space<vmem>>, %arg3: memref<1x128xf32, #tpu.memory_space<vmem>>, %arg4: memref<16x128xbf16, #tpu.memory_space<vmem>>) attributes {dimension_semantics = [#tpu.dimension_semantics<parallel>], iteration_bounds = array<i64: 2>, scalar_prefetch = 0 : i64, scratch_operands = 0 : i64, tpu.core_type = #tpu.core_type<tc>, window_params = [{transform_indices = @transform_0, window_bounds = array<i64: 16, 128>}, {pipeline_mode = #tpu.pipeline_mode<synchronous>, transform_indices = @transform_1, window_bounds = array<i64: 1, 128>}, {pipeline_mode = #tpu.pipeline_mode<synchronous>, transform_indices = @transform_2, window_bounds = array<i64: 1, 128>}, {transform_indices = @transform_3, window_bounds = array<i64: 16, 128>}]} {
    %c0 = arith.constant 0 : index
    %c0_0 = arith.constant 0 : index
    %0 = vector.load %arg1[%c0, %c0_0] : memref<16x128xbf16, #tpu.memory_space<vmem>>, vector<16x128xbf16>
    %1 = arith.extf %0 : vector<16x128xbf16> to vector<16x128xf32>
    %c0_1 = arith.constant 0 : index
    %c0_2 = arith.constant 0 : index
    %2 = vector.load %arg2[%c0_1, %c0_2] : memref<1x128xf32, #tpu.memory_space<vmem>>, vector<1x128xf32>
    %3 = vector.broadcast %2 : vector<1x128xf32> to vector<16x128xf32>
    %4 = arith.mulf %1, %3 : vector<16x128xf32>
    %c0_3 = arith.constant 0 : index
    %c0_4 = arith.constant 0 : index
    %5 = vector.load %arg3[%c0_3, %c0_4] : memref<1x128xf32, #tpu.memory_space<vmem>>, vector<1x128xf32>
    %6 = vector.broadcast %5 : vector<1x128xf32> to vector<16x128xf32>
    %7 = arith.addf %4, %6 : vector<16x128xf32>
    %8 = arith.truncf %7 : vector<16x128xf32> to vector<16x128xbf16>
    %c0_5 = arith.constant 0 : index
    %c0_6 = arith.constant 0 : index
    %9 = vector.load %arg4[%c0_5, %c0_6] : memref<16x128xbf16, #tpu.memory_space<vmem>>, vector<16x128xbf16>
    tpu.vector_store %arg4[%c0_5, %c0_6], %8 {strides = array<i32>} : memref<16x128xbf16, #tpu.memory_space<vmem>>, vector<16x128xbf16>,
    return
  }
  func.func @transform_0(%arg0: i32) -> (i32, i32) {
    %c0_i32 = arith.constant 0 : i32
    %c0_i32_0 = arith.constant 0 : i32
    return %arg0, %c0_i32 : i32, i32
  }
  func.func @transform_1(%arg0: i32) -> (i32, i32) {
    %c0_i32 = arith.constant 0 : i32
    %c0_i32_0 = arith.constant 0 : i32
    %c0_i32_1 = arith.constant 0 : i32
    return %c0_i32, %c0_i32_0 : i32, i32
  }
  func.func @transform_2(%arg0: i32) -> (i32, i32) {
    %c0_i32 = arith.constant 0 : i32
    %c0_i32_0 = arith.constant 0 : i32
    %c0_i32_1 = arith.constant 0 : i32
    return %c0_i32, %c0_i32_0 : i32, i32
  }
  func.func @transform_3(%arg0: i32) -> (i32, i32) {
    %c0_i32 = arith.constant 0 : i32
    %c0_i32_0 = arith.constant 0 : i32
    return %arg0, %c0_i32 : i32, i32
  }
}

</mosaic_0001>

<bundles_post_ra>
// kernel: _lambda_.2
= control target key start
LH: loop header
LB: loop body
LE: loop exit
PB: predicated region body
PF: predicated region fallthrough
CT: control target
= control target key end

     0   :  { %s666_s15 = smov 0   ;;  %s737_s0 = inlined_call_operand.vmem [shape: bf16[2,18,72], index: 0, kind: input, shape index: {}]   ;;  %s738_s1 = inlined_call_operand.vmem [shape: bf16[216,128], index: 1, kind: input, shape index: {}]   ;;  %s739_s2 = inlined_call_operand.vmem [shape: bf16[2,16,128], index: 2, kind: output, shape index: {0}]   ;;  %s740_s3 = inlined_call_operand.vmem [shape: f32[2,1,128], index: 3, kind: output, shape index: {1}]   ;;  %s741_s4 = inlined_call_operand.vmem [shape: f32[2,1,128], index: 4, kind: output, shape index: {2}]  }
   0x1 LB: > { %s534_s16 = sadd.s32 4294967295, %s637_s15   ;;  %p538_p0 = scmp.ge.s32.totalorder %s637_s15, 1  ;;  %s637_s15 = sphi %s666_s15, %s15_s15  }
   0x2   : > { %p167_p1 = scmp.lt.s32.totalorder %s637_s15, 3 }
   0x4   : > { %p168_p2 = pnand %p538_p0, %p167_p1 }
   0x5   : > { %p199_p3 = scmp.lt.s32.totalorder (!%p168_p2), %s534_s16, 1  ;;  %s639_s19 = smov (!%p168_p2), 72  }
   0x6   : > { %171 = sbr.rel (%p168_p2) target bundleno = 310 (0x136), region = 28  ;;  %s640_s22 = smov (!%p168_p2), 16  }
   0xb   : > { %v605_v0 = vld [vmem:[%s738_s1 + $0x38] sm:$0xff]  ;;  %s743_s16 = smov (!%p199_p3, %s534_s16), 1  ;;  %v290_v1 = vld [vmem:[%s738_s1 + $0x68] sm:$0xf]  ;;  %v604_v2 = vld [vmem:[%s738_s1 + $0x30] sm:$0xff]  ;;  %vm375_vm0 = vcmask 1043456  }
   0xc   : > { %379 = vmatpush.bf16.msra.mxu0 %v605_v0  ;;  %v344_v3 = vunpack.c.l.b16 %v290_v1  ;;  %s620_s23 = smul.u32 12, %s743_s16  ;;  %v603_v7 = vld [vmem:[%s738_s1 + $0x28] sm:$0xff]  ;;  %v610_v12 = vld [vmem:[%s738_s1 + $0x60] sm:$0xff]  ;;  %v609_v20 = vld [vmem:[%s738_s1 + $0x58] sm:$0xff]  ;;  %vm236_vm1 = vsmask.f32 7424  ;;  %s211_s7 = scalar_lea.vmem %s740_s3, %s743_s16 }
   0xd   : > { %v602_v16 = vld [vmem:[%s738_s1 + $0x20] sm:$0xff]  ;;  %v601_v24 = vld [vmem:[%s738_s1 + $0x18] sm:$0xff]  ;;  %v608_v27 = vld [vmem:[%s738_s1 + $0x50] sm:$0xff]  ;;  %vm251_vm2 = vcmask 1046528   ;;  %vm257_vm3 = vcmask 588800   ;;  %vm261_vm4 = vcmask 130048   ;;  %s214_s10 = scalar_lea.vmem %s741_s4, %s743_s16 }
   0xe   : > { %v358_v4 = vpack.c.b16 %v344_v3, %v344_v3  ;;  %s203_s26 = scalar_lea.vmem %s737_s0, %s620_s23  ;;  %v600_v31 = vld [vmem:[%s738_s1 + $0x10] sm:$0xff]  ;;  %v599_v35 = vld [vmem:[%s738_s1 + $0x8] sm:$0xff]  ;;  %v598_v39 = vld [vmem:[%s738_s1] sm:$0xff]  ;;  %vm372_vm5 = vcmask 719872   ;;  %s597_s27 = sshll.u32 %s743_s16, 3 }
   0xf   : > { %v612_v5 = vld [vmem:[%s203_s26] sm:$0xff]   ;;  %v218_v6 = vld [vmem:[%s203_s26 + $0x8] sm:$0x1]  ;;  %s208_s30 = scalar_lea.vmem %s739_s2, %s597_s27 }
  0x10   : > { %380 = vmatpush.bf16.msra.mxu0 %v604_v2  ;;  %v377_v8 = vsel %vm375_vm0, %v358_v4, 0  ;;  %v613_v9 = vunpack.c.l.bf16 %v612_v5  ;;  %v614_v10 = vunpack.c.h.bf16 %v612_v5  ;;  %v221_v11 = vunpack.c.l.bf16 %v218_v6  ;;  %v607_v41 = vld [vmem:[%s738_s1 + $0x48] sm:$0xff]  ;;  %v606_v42 = vld [vmem:[%s738_s1 + $0x40] sm:$0xff] }
  0x11   : > { %395 = vmatpush.bf16.msra.mxu1 %v377_v8 }
  0x12   : > { %v222_v13 = vmax.f32 %v613_v9, 0.0  ;;  %v223_v14 = vmax.f32 %v614_v10, 0.0  ;;  %v224_v15 = vmax.f32 %v221_v11, 0.0 }
  0x14   : > { %381 = vmatpush.bf16.msra.mxu0 %v603_v7  ;;  %v225_v17 = vpack.c.bf16 %v222_v13, %v222_v13  ;;  %v226_v18 = vpack.c.bf16 %v223_v14, %v223_v14  ;;  %v227_v19 = vpack.c.bf16 %v224_v15, %v224_v15 }
  0x15   : > { %396 = vmatpush.bf16.msra.mxu1 %v610_v12 }
  0x16   : > { %v230_v21 = vunpack.c.l.b16 %v225_v17  ;;  %v231_v22 = vunpack.c.l.b16 %v226_v18  ;;  %v234_v23 = vunpack.c.l.b16 %v227_v19 }
  0x18   : > { %382 = vmatpush.bf16.msra.mxu0 %v602_v16  ;;  %v232_v25 = vpack.c.b16 %v231_v22, %v230_v21  ;;  %v235_v26 = vpack.c.b16 %v234_v23, %v234_v23 }
  0x19   : > { %397 = vmatpush.bf16.msra.mxu1 %v609_v20 }
  0x1a   : > { %v238_v28 = vshrl.u32 %v232_v25, 16  ;;  %v240_v29 = vshll.u32 %v232_v25, 16  ;;  %v245_v30 = vshll.u32 %v235_v26, 16  ;;  %v252_v37 = vrot.slane %v232_v25, 1 }
  0x1b   : > { %v253_v38 = vrot.slane %v235_v26, 1 }
  0x1c   : > { %383 = vmatpush.bf16.msra.mxu0 %v601_v24  ;;  %v242_v32 = vrot.slane %v240_v29, 1  ;;  %v247_v33 = vrot.slane %v245_v30, 1 }
  0x1d   : > { %398 = vmatpush.bf16.msra.mxu1 %v608_v27  ;;  %v254_v40 = vsel %vm251_vm2, %v252_v37, %v253_v38 }
  0x1e   : > { %v243_v34 = vor.u32 %v242_v32, %v238_v28 }
  0x20   : > { %384 = vmatpush.bf16.msra.mxu0 %v600_v31  ;;  %v248_v36 = vsel %vm236_vm1, %v243_v34, %v247_v33 }
  0x21   : > { %249 = vrot.lane.b32.xlu0 %v248_v36, %s639_s19  ;;  %399 = vmatpush.bf16.msra.mxu1 %v607_v41 }
  0x24   : > { %385 = vmatpush.bf16.msra.mxu0 %v599_v35 }
  0x25   : > { %400 = vmatpush.bf16.msra.mxu1 %v606_v42 }
  0x28   : > { %386 = vmatpush.bf16.msra.mxu0 %v598_v39 }
  0x29   : > { %255 = vrot.lane.b32.xlu0 %v254_v40, %s640_s22 }
  0x93   : > { %v250_v43 = vpop.permute.xlu0 %249 }
  0x94   : > { %v259_v44 = vsel %vm257_vm3, %v232_v25, %v250_v43 }
  0x95   : > { %387 = vmatmul.bf16.vlgmr.msra.gmra.mxu0 %v259_v44 }
  0x9b   : > { %v256_v45 = vpop.permute.xlu0 %255 }
  0x9c   : > { %v263_v46 = vsel %vm261_vm4, %v250_v43, %v256_v45 }
  0x9d   : > { %594 = vmatmul.msk.bf16.vlgmr.msra.gmra.mxu1 %vm372_vm5, %v263_v46 }
 0x112   : > { %v388_v47 = vpop.f32.mrf.mxu0 }
 0x11a   : > { %v402_v48 = vpop.f32.mrf.mxu1  ;;  %v390_v50 = vpop.f32.mrf.mxu0 }
 0x11b   : > { %v403_v49 = vadd.f32 %v402_v48, %v388_v47 }
 0x11d   : > { %v419_v53 = vmul.f32 %v403_v49, %v403_v49 }
 0x122   : > { %v404_v51 = vpop.f32.mrf.mxu1 }
 0x123   : > { %v405_v52 = vadd.f32 %v404_v51, %v390_v50 }
 0x125   : > { %v618_v54 = vpack.c.bf16 %v405_v52, %v403_v49  ;;  %v411_v55 = vadd.f32 %v405_v52, %v403_v49  ;;  %v420_v56 = vmul.f32 %v405_v52, %v405_v52 }
 0x127   : > { %619 = vst [vmem:[%s208_s30] sm:$0xff] %v618_v54   ;;  %v412_v57 = vrot.slane %v411_v55, 4  ;;  %v421_v58 = vadd.f32 %v420_v56, %v419_v53 }
 0x129   : > { %v413_v59 = vadd.f32 %v412_v57, %v411_v55  ;;  %v422_v60 = vrot.slane %v421_v58, 4 }
 0x12b   : > { %v414_v61 = vrot.slane %v413_v59, 2  ;;  %v423_v62 = vadd.f32 %v422_v60, %v421_v58 }
 0x12d   : > { %v415_v63 = vadd.f32 %v414_v61, %v413_v59  ;;  %v424_v0 = vrot.slane %v423_v62, 2 }
 0x12f   : > { %v416_v1 = vrot.slane %v415_v63, 1  ;;  %v425_v2 = vadd.f32 %v424_v0, %v423_v62 }
 0x131   : > { %v417_v3 = vadd.f32 %v416_v1, %v415_v63  ;;  %v426_v4 = vrot.slane %v425_v2, 1 }
 0x133   : > { %418 = vst [vmem:[%s211_s7] sm:$0x1] %v417_v3  ;;  %v427_v5 = vadd.f32 %v426_v4, %v425_v2 }
 0x135   : > { %428 = vst [vmem:[%s214_s10] sm:$0x1] %v427_v5 }
 0x136 PF: > { %s15_s15 = sadd.s32 1, %s637_s15  }
 0x137   : > { %p12_p4 = scmp.ge.s32.totalorder %s15_s15, 4  }
 0x139   :  { %14 = sbr.rel (!%p12_p4) target bundleno = 1 (0x1), region = 82 }

// kernel: tile.13
= control target key start
LH: loop header
LB: loop body
LE: loop exit
PB: predicated region body
PF: predicated region fallthrough
CT: control target
= control target key end

     0   :  { %s28_s0 = inlined_call_operand.vmem [shape: f32[8], index: 0, kind: input, shape index: {}]   ;;  %s29_s1 = inlined_call_operand.vmem [shape: f32[16,8], index: 1, kind: output, shape index: {}]  }
   0x1   :  { %v4_v0 = vld [vmem:[%s28_s0] ss:$0 sm:$0xff] }
   0x2   :  { %5 = vst [vmem:[%s29_s1] sm:$0xff] %v4_v0 }
   0x3   :  { %8 = vst [vmem:[%s29_s1 + $0x8] sm:$0xff] %v4_v0 }

// kernel: _lambda_.3
= control target key start
LH: loop header
LB: loop body
LE: loop exit
PB: predicated region body
PF: predicated region fallthrough
CT: control target
= control target key end

     0   :  { %s308_s12 = smov 0   ;;  %s325_s0 = inlined_call_operand.vmem [shape: bf16[32,128], index: 0, kind: input, shape index: {}, may-alias: {0,3}]   ;;  %s326_s1 = inlined_call_operand.vmem [shape: f32[1,128], index: 1, kind: input, shape index: {}]   ;;  %s327_s2 = inlined_call_operand.vmem [shape: f32[1,128], index: 2, kind: input, shape index: {}]   ;;  %s328_s3 = inlined_call_operand.vmem [shape: bf16[32,128], index: 3, kind: output, shape index: {}, may-alias: {0,3}]  }
   0x1 LB: > { %s250_s13 = sadd.s32 4294967295, %s286_s12   ;;  %p254_p0 = scmp.ge.s32.totalorder %s286_s12, 1  ;;  %s286_s12 = sphi %s308_s12, %s13_s12  }
   0x2   : > { %p138_p1 = scmp.lt.s32.totalorder %s286_s12, 3 }
   0x4   : > { %p139_p2 = pnand %p254_p0, %p138_p1 }
   0x5   : > { %s255_s14 = sshll.u32 (!%p139_p2), %s250_s13, 1 }
   0x6   : > { %142 = sbr.rel (%p139_p2) target bundleno = 24 (0x18), region = 32  ;;  %p163_p3 = scmp.lt.s32.totalorder (!%p139_p2), %s255_s14, 3 }
   0xb   : > { %s330_s14 = smov (!%p163_p3, %s255_s14), 3  ;;  %v278_v0 = vld [vmem:[%s326_s1] ss:$0 sm:$0xff] }
   0xc   : > { %s256_s15 = sshll.u32 %s330_s14, 2  ;;  %v279_v4 = vld [vmem:[%s327_s2] ss:$0 sm:$0xff] }
   0xd   : > { %s166_s18 = scalar_lea.vmem %s325_s0, %s256_s15  ;;  %s172_s25 = scalar_lea.vmem %s328_s3, %s256_s15 }
   0xe   : > { %v262_v1 = vld [vmem:[%s166_s18] sm:$0xff]  }
   0xf   : > { %v263_v2 = vunpack.c.l.bf16 %v262_v1  ;;  %v264_v3 = vunpack.c.h.bf16 %v262_v1 }
  0x11   : > { %v182_v5 = vmul.f32 %v278_v0, %v263_v2  ;;  %v183_v6 = vmul.f32 %v278_v0, %v264_v3 }
  0x13   : > { %v188_v7 = vadd.f32 %v279_v4, %v182_v5  ;;  %v189_v8 = vadd.f32 %v279_v4, %v183_v6 }
  0x15   : > { %v268_v9 = vpack.c.bf16 %v189_v8, %v188_v7 }
  0x17   : > { %269 = vst [vmem:[%s172_s25] sm:$0xff] %v268_v9  }
  0x18 PF: > { %s13_s12 = sadd.s32 1, %s286_s12  }
  0x19   : > { %p10_p4 = scmp.ge.s32.totalorder %s13_s12, 4  }
  0x1b   :  { %12 = sbr.rel (!%p10_p4) target bundleno = 1 (0x1), region = 62 }

</bundles_post_ra>
